<compile_context>
chip_gen: v6e
topology: v6e:2x2x1
jax: 0.10.0
libtpu: 0.0.40
codegen_flags: <defaults>
</compile_context>

<pallas_src>
import jax
import jax.numpy as jnp
from jax import lax
from jax.experimental import pallas as pl
from jax.experimental.pallas import tpu as pltpu

_MIB = 1024 * 1024


def _round_up(x, m):
    return ((x + m - 1) // m) * m


def _vmem_capacity_bytes():
    """Physical VMEM per TensorCore (128 MiB on v5e/v6e, 64 MiB on v7x)."""
    try:
        cap = getattr(pltpu.get_tpu_info(), "vmem_capacity_bytes", None)
        if cap:
            return int(cap)
    except Exception:
        pass
    return 64 * _MIB  # conservative fallback (v7x-sized), never over-commits


# ---------------------------------------------------------------------------
# Kernel bodies
# ---------------------------------------------------------------------------

def ffn_kernel_single(x_ref, w1_ref, b1_ref, w2t_ref, b2_ref, o_ref):
    # x_ref  : (tm, d_model)         current row tile
    # w1_ref : (d_ff_pad, d_model)   lin_1 weight (PyTorch layout), resident
    # b1_ref : (1, d_ff_pad)         lin_1 bias
    # w2t_ref: (d_ff_pad, d_model)   lin_2 weight, pre-transposed, resident
    # b2_ref : (1, d_model)          lin_2 bias
    # o_ref  : (tm, d_model)         output row tile
    # h = relu(x @ W1^T + b1)   (NT matmul, f32 MXU accumulation)
    h = lax.dot_general(
        x_ref[...], w1_ref[...],
        dimension_numbers=(((1,), (1,)), ((), ())),
        preferred_element_type=jnp.float32,
    )
    h = jnp.maximum(h + b1_ref[...], 0.0)
    # dropout: eval-mode -> identity.
    # out = h @ W2^T + b2       (W2 pre-transposed -> NN matmul, contiguous slab)
    out = lax.dot_general(
        h.astype(w2t_ref.dtype), w2t_ref[...],
        dimension_numbers=(((1,), (0,)), ((), ())),
        preferred_element_type=jnp.float32,
    )
    o_ref[...] = (out + b2_ref[...]).astype(o_ref.dtype)


def ffn_kernel_reduce(x_ref, w1_ref, b1_ref, w2t_ref, b2_ref, o_ref, acc_ref):
    # Same as above but d_ff is tiled as an "arbitrary" reduction axis with an
    # f32 VMEM accumulator:
    #   out = sum_k relu(x @ W1[k_slab,:]^T + b1[k_slab]) @ W2^T[k_slab,:] + b2
    # Exact because ReLU acts per d_ff column.
    k = pl.program_id(1)

    @pl.when(k == 0)
    def _():
        acc_ref[...] = jnp.zeros_like(acc_ref)

    h = lax.dot_general(
        x_ref[...], w1_ref[...],
        dimension_numbers=(((1,), (1,)), ((), ())),
        preferred_element_type=jnp.float32,
    )
    h = jnp.maximum(h + b1_ref[...], 0.0)
    # dropout: eval-mode -> identity.
    acc_ref[...] += lax.dot_general(
        h.astype(w2t_ref.dtype), w2t_ref[...],
        dimension_numbers=(((1,), (0,)), ((), ())),
        preferred_element_type=jnp.float32,
    )

    @pl.when(k == pl.num_programs(1) - 1)
    def _():
        o_ref[...] = (acc_ref[...] + b2_ref[...]).astype(o_ref.dtype)


# ---------------------------------------------------------------------------
# Wrapper
# ---------------------------------------------------------------------------

def feed_forward(x, w1, b1, w2, b2, *, tm=None, tn_ff=None):
    """x: [batch, seq, d_model]; w1: [d_ff, d_model]; b1: [d_ff];
       w2: [d_model, d_ff]; b2: [d_model]   (PyTorch Linear conventions)."""
    batch, seq, d_model = x.shape
    d_ff = w1.shape[0]
    M = batch * seq
    itemsize = jnp.dtype(x.dtype).itemsize

    vmem_cap = _vmem_capacity_bytes()
    budget = int(0.80 * vmem_cap)            # leave Mosaic internal headroom
    resident_budget = int(0.65 * vmem_cap)   # stricter bar for resident weights

    # ---- per-(tm, tn_ff) VMEM footprint (double-buffered I/O + temps) ----
    def _footprint(tm_, tn_):
        f = 2 * tm_ * d_model * itemsize          # x tile
        f += 2 * tm_ * d_model * itemsize         # out tile
        f += 2 * tn_ * d_model * itemsize         # W1 slab
        f += 2 * tn_ * d_model * itemsize         # W2^T slab
        f += 2 * 8 * tn_ * itemsize               # b1 slab (sublane-padded)
        f += 2 * 8 * d_model * itemsize           # b2
        f += tm_ * tn_ * 4                        # h (f32 matmul-1 result)
        if itemsize < 4:
            f += tm_ * tn_ * itemsize             # h cast copy for matmul 2
        f += tm_ * d_model * 4                    # f32 accumulator / matmul-2 result
        return f

    # ---- row-tile selection ----
    if tm is None:
        tm = 512 if itemsize < 4 else 256         # weight-streaming roofline
    if M <= 128:
        tm = _round_up(max(M, 1), 8)              # tiny problem: don't over-pad
    else:
        tm = max(128, (min(tm, _round_up(M, 128)) // 128) * 128)
        if M >= 256:
            # keep >= 2 row blocks so v7x's two TensorCores both get work
            half = _round_up((M + 1) // 2, 128)
            tm = min(tm, half)

    # ---- d_ff tiling: resident fast path, else largest slab that fits ----
    d_ff_128 = _round_up(d_ff, 128)
    if _footprint(tm, d_ff_128) <= resident_budget:
        tn_ff = d_ff_128                          # whole d_ff resident in VMEM
    else:
        if tn_ff is None:
            tn_ff = 512
        tn_ff = max(128, (min(tn_ff, d_ff_128) // 128) * 128)
        # grow while headroom allows (fewer acc RMW passes / grid steps) ...
        while tn_ff * 2 <= d_ff_128 and _footprint(tm, tn_ff * 2) <= budget:
            tn_ff *= 2
        # ... shrink the slab, then the row tile, if over budget
        while tn_ff > 128 and _footprint(tm, tn_ff) > budget:
            tn_ff //= 2
        while tm > 128 and _footprint(tm, tn_ff) > budget:
            tm = max(128, tm - 128)

    d_ff_pad = _round_up(d_ff, tn_ff)
    M_pad = _round_up(M, tm)
    single_pass = (d_ff_pad == tn_ff)             # degenerate reduction axis

    # ---- pad ragged dims with zeros (padding contributes nothing / is sliced off) ----
    x2d = x.reshape(M, d_model)
    if M_pad != M:
        x2d = jnp.pad(x2d, ((0, M_pad - M), (0, 0)))

    w2t = w2.T                                    # [d_ff, d_model]: contiguous row-slice slabs
    if d_ff_pad != d_ff:
        pad_ff = d_ff_pad - d_ff
        w1 = jnp.pad(w1, ((0, pad_ff), (0, 0)))
        b1 = jnp.pad(b1, ((0, pad_ff),))
        w2t = jnp.pad(w2t, ((0, pad_ff), (0, 0)))

    b1_2d = b1.reshape(1, d_ff_pad)
    b2_2d = b2.reshape(1, d_model)

    footprint = _footprint(tm, tn_ff)
    vmem_limit = int(min(int(0.875 * vmem_cap),
                         max(32 * _MIB, int(1.3 * footprint))))

    n_row_blocks = M_pad // tm
    weight_stream = 1 if single_pass else n_row_blocks   # resident weights fetched once
    cost = pl.CostEstimate(
        flops=4 * M_pad * d_model * d_ff_pad,             # two matmuls
        transcendentals=0,
        bytes_accessed=int(
            (x2d.size + M_pad * d_model) * itemsize
            + weight_stream * (w1.size + w2t.size) * itemsize
            + (b1_2d.size + b2_2d.size) * itemsize
        ),
    )

    if single_pass:
        grid = (n_row_blocks,)
        out2d = pl.pallas_call(
            ffn_kernel_single,
            out_shape=jax.ShapeDtypeStruct((M_pad, d_model), x.dtype),
            grid_spec=pltpu.PrefetchScalarGridSpec(
                num_scalar_prefetch=0,
                grid=grid,
                in_specs=[
                    pl.BlockSpec((tm, d_model), lambda i: (i, 0)),        # x rows
                    pl.BlockSpec((d_ff_pad, d_model), lambda i: (0, 0)),  # W1 (resident)
                    pl.BlockSpec((1, d_ff_pad), lambda i: (0, 0)),        # b1
                    pl.BlockSpec((d_ff_pad, d_model), lambda i: (0, 0)),  # W2^T (resident)
                    pl.BlockSpec((1, d_model), lambda i: (0, 0)),         # b2
                ],
                out_specs=pl.BlockSpec((tm, d_model), lambda i: (i, 0)),
            ),
            compiler_params=pltpu.CompilerParams(
                dimension_semantics=("parallel",),
                vmem_limit_bytes=vmem_limit,
            ),
            cost_estimate=cost,
        )(x2d, w1, b1_2d, w2t, b2_2d)
    else:
        grid = (n_row_blocks, d_ff_pad // tn_ff)
        out2d = pl.pallas_call(
            ffn_kernel_reduce,
            out_shape=jax.ShapeDtypeStruct((M_pad, d_model), x.dtype),
            grid_spec=pltpu.PrefetchScalarGridSpec(
                num_scalar_prefetch=0,
                grid=grid,
                in_specs=[
                    pl.BlockSpec((tm, d_model), lambda i, k: (i, 0)),     # x rows
                    pl.BlockSpec((tn_ff, d_model), lambda i, k: (k, 0)),  # W1 slab
                    pl.BlockSpec((1, tn_ff), lambda i, k: (0, k)),        # b1 slab
                    pl.BlockSpec((tn_ff, d_model), lambda i, k: (k, 0)),  # W2^T slab (contiguous)
                    pl.BlockSpec((1, d_model), lambda i, k: (0, 0)),      # b2
                ],
                out_specs=pl.BlockSpec((tm, d_model), lambda i, k: (i, 0)),
                scratch_shapes=[pltpu.VMEM((tm, d_model), jnp.float32)],
            ),
            compiler_params=pltpu.CompilerParams(
                dimension_semantics=("parallel", "arbitrary"),
                vmem_limit_bytes=vmem_limit,
            ),
            cost_estimate=cost,
        )(x2d, w1, b1_2d, w2t, b2_2d)

    return out2d[:M].reshape(batch, seq, d_model)


if __name__ == "__main__":
    # Small shapes consistent with the module: [batch, seq, d_model], d_ff hidden.
    batch, seq, d_model, d_ff = 2, 8, 32, 128

    key = jax.random.PRNGKey(0)
    kx, kw1, kb1, kw2, kb2 = jax.random.split(key, 5)

    x = jax.random.normal(kx, (batch, seq, d_model), dtype=jnp.float32)

    # Deterministic parameter init (PyTorch Linear shapes: W [out, in], b [out]).
    bound1 = 1.0 / (d_model ** 0.5)
    w1 = jax.random.uniform(kw1, (d_ff, d_model), jnp.float32, -bound1, bound1)
    b1 = jax.random.uniform(kb1, (d_ff,), jnp.float32, -bound1, bound1)
    bound2 = 1.0 / (d_ff ** 0.5)
    w2 = jax.random.uniform(kw2, (d_model, d_ff), jnp.float32, -bound2, bound2)
    b2 = jax.random.uniform(kb2, (d_model,), jnp.float32, -bound2, bound2)

    out = feed_forward(x, w1, b1, w2, b2)
    jax.block_until_ready(out)

    # Reference check in plain JAX (eval-mode dropout = identity).
    ref = jnp.maximum(x @ w1.T + b1, 0.0) @ w2.T + b2
    assert out.shape == ref.shape
    assert jnp.allclose(out, ref, atol=1e-4, rtol=1e-4), "mismatch vs reference"

    print("KERNEL_OK")
</pallas_src>

<mosaic_0001>
module attributes {stable_mosaic.version = 11 : i64} {
  func.func @ffn_kernel_single(%arg0: i32, %arg1: memref<16x32xf32, #tpu.memory_space<vmem>>, %arg2: memref<128x32xf32, #tpu.memory_space<vmem>>, %arg3: memref<1x128xf32, #tpu.memory_space<vmem>>, %arg4: memref<128x32xf32, #tpu.memory_space<vmem>>, %arg5: memref<1x32xf32, #tpu.memory_space<vmem>>, %arg6: memref<16x32xf32, #tpu.memory_space<vmem>>) attributes {dimension_semantics = [#tpu.dimension_semantics<parallel>], iteration_bounds = array<i64: 1>, scalar_prefetch = 0 : i64, scratch_operands = 0 : i64, tpu.core_type = #tpu.core_type<tc>, window_params = [{transform_indices = @transform_0, window_bounds = array<i64: 16, 32>}, {pipeline_mode = #tpu.pipeline_mode<synchronous>, transform_indices = @transform_1, window_bounds = array<i64: 128, 32>}, {pipeline_mode = #tpu.pipeline_mode<synchronous>, transform_indices = @transform_2, window_bounds = array<i64: 1, 128>}, {pipeline_mode = #tpu.pipeline_mode<synchronous>, transform_indices = @transform_3, window_bounds = array<i64: 128, 32>}, {pipeline_mode = #tpu.pipeline_mode<synchronous>, transform_indices = @transform_4, window_bounds = array<i64: 1, 32>}, {transform_indices = @transform_5, window_bounds = array<i64: 16, 32>}]} {
    %c0 = arith.constant 0 : index
    %c0_0 = arith.constant 0 : index
    %0 = vector.load %arg1[%c0, %c0_0] : memref<16x32xf32, #tpu.memory_space<vmem>>, vector<16x32xf32>
    %c0_1 = arith.constant 0 : index
    %c0_2 = arith.constant 0 : index
    %1 = vector.load %arg2[%c0_1, %c0_2] : memref<128x32xf32, #tpu.memory_space<vmem>>, vector<128x32xf32>
    %cst = arith.constant dense<0.000000e+00> : vector<16x128xf32>
    %2 = tpu.matmul %0, %1, %cst {dimension_numbers = #tpu.dot_dimension_numbers<[1], [1], [0], [0], [0, 0, 1, 0], [], []>} : vector<16x32xf32>, vector<128x32xf32>, vector<16x128xf32> -> vector<16x128xf32>
    %c0_3 = arith.constant 0 : index
    %c0_4 = arith.constant 0 : index
    %3 = vector.load %arg3[%c0_3, %c0_4] : memref<1x128xf32, #tpu.memory_space<vmem>>, vector<1x128xf32>
    %4 = vector.broadcast %3 : vector<1x128xf32> to vector<16x128xf32>
    %5 = arith.addf %2, %4 : vector<16x128xf32>
    %cst_5 = arith.constant 0.000000e+00 : f32
    %6 = vector.broadcast %cst_5 : f32 to vector<16x128xf32>
    %7 = arith.maximumf %5, %6 : vector<16x128xf32>
    %c0_6 = arith.constant 0 : index
    %c0_7 = arith.constant 0 : index
    %8 = vector.load %arg4[%c0_6, %c0_7] : memref<128x32xf32, #tpu.memory_space<vmem>>, vector<128x32xf32>
    %cst_8 = arith.constant dense<0.000000e+00> : vector<16x32xf32>
    %9 = tpu.matmul %7, %8, %cst_8 {dimension_numbers = #tpu.dot_dimension_numbers<[1], [0], [0], [1], [0, 0, 1, 1], [], []>} : vector<16x128xf32>, vector<128x32xf32>, vector<16x32xf32> -> vector<16x32xf32>
    %c0_9 = arith.constant 0 : index
    %c0_10 = arith.constant 0 : index
    %10 = vector.load %arg5[%c0_9, %c0_10] : memref<1x32xf32, #tpu.memory_space<vmem>>, vector<1x32xf32>
    %11 = vector.broadcast %10 : vector<1x32xf32> to vector<16x32xf32>
    %12 = arith.addf %9, %11 : vector<16x32xf32>
    %c0_11 = arith.constant 0 : index
    %c0_12 = arith.constant 0 : index
    %13 = vector.load %arg6[%c0_11, %c0_12] : memref<16x32xf32, #tpu.memory_space<vmem>>, vector<16x32xf32>
    tpu.vector_store %arg6[%c0_11, %c0_12], %12 {strides = array<i32>} : memref<16x32xf32, #tpu.memory_space<vmem>>, vector<16x32xf32>,
    return
  }
  func.func @transform_0(%arg0: i32) -> (i32, i32) {
    %c0_i32 = arith.constant 0 : i32
    %c0_i32_0 = arith.constant 0 : i32
    return %arg0, %c0_i32 : i32, i32
  }
  func.func @transform_1(%arg0: i32) -> (i32, i32) {
    %c0_i32 = arith.constant 0 : i32
    %c0_i32_0 = arith.constant 0 : i32
    %c0_i32_1 = arith.constant 0 : i32
    return %c0_i32, %c0_i32_0 : i32, i32
  }
  func.func @transform_2(%arg0: i32) -> (i32, i32) {
    %c0_i32 = arith.constant 0 : i32
    %c0_i32_0 = arith.constant 0 : i32
    %c0_i32_1 = arith.constant 0 : i32
    return %c0_i32, %c0_i32_0 : i32, i32
  }
  func.func @transform_3(%arg0: i32) -> (i32, i32) {
    %c0_i32 = arith.constant 0 : i32
    %c0_i32_0 = arith.constant 0 : i32
    %c0_i32_1 = arith.constant 0 : i32
    return %c0_i32, %c0_i32_0 : i32, i32
  }
  func.func @transform_4(%arg0: i32) -> (i32, i32) {
    %c0_i32 = arith.constant 0 : i32
    %c0_i32_0 = arith.constant 0 : i32
    %c0_i32_1 = arith.constant 0 : i32
    return %c0_i32, %c0_i32_0 : i32, i32
  }
  func.func @transform_5(%arg0: i32) -> (i32, i32) {
    %c0_i32 = arith.constant 0 : i32
    %c0_i32_0 = arith.constant 0 : i32
    return %arg0, %c0_i32 : i32, i32
  }
}

</mosaic_0001>

<bundles_post_ra>
// kernel: tpu_custom_call.1
= control target key start
LH: loop header
LB: loop body
LE: loop exit
PB: predicated region body
PF: predicated region fallthrough
CT: control target
= control target key end

     0   :  { %vm46_vm0 = vcmask 261120   ;;  %s625_s0 = inlined_call_operand.vmem [shape: f32[16,32], index: 0, kind: input, shape index: {}]   ;;  %s626_s1 = inlined_call_operand.vmem [shape: f32[128,32], index: 1, kind: input, shape index: {}]   ;;  %s627_s2 = inlined_call_operand.vmem [shape: f32[1,128], index: 2, kind: input, shape index: {}]   ;;  %s628_s3 = inlined_call_operand.vmem [shape: f32[128,32], index: 3, kind: input, shape index: {}]   ;;  %s629_s4 = inlined_call_operand.vmem [shape: f32[1,32], index: 4, kind: input, shape index: {}]   ;;  %s630_s5 = inlined_call_operand.hbm [shape: f32[16,32], index: 5, kind: output, shape index: {}]  }
   0x1   :  { %v38_v0 = vld [vmem:[%s626_s1 + $0x78] sm:$0xff]  ;;  %v37_v1 = vld [vmem:[%s626_s1 + $0x70] sm:$0xff]  ;;  %v36_v2 = vld [vmem:[%s626_s1 + $0x68] sm:$0xff] }
   0x2   :  { %350 = vmatprep.subr.msk.mxu0 %vm46_vm0, %v38_v0  ;;  %v21_v3 = vld [vmem:[%s625_s0] sm:$0xff]  ;;  %v193_v4 = vld [vmem:[%s628_s3 + $0x78] sm:$0xff]  ;;  %v192_v5 = vld [vmem:[%s628_s3 + $0x70] sm:$0xff] }
   0x3   :  { %351 = vmatpush3.xpose.msk.msra.mxu0 %vm46_vm0, %v38_v0  ;;  %382 = vmatprep.mubr.msk.f32.mxu0 %vm46_vm0, %v21_v3  ;;  %v35_v6 = vld [vmem:[%s626_s1 + $0x60] sm:$0xff]  ;;  %v191_v7 = vld [vmem:[%s628_s3 + $0x68] sm:$0xff] }
   0x4   :  { %352 = vmatprep.subr.msk.mxu0 %vm46_vm0, %v37_v1  ;;  %385 = vmatprep.subr.mxu1 %v193_v4  ;;  %v190_v8 = vld [vmem:[%s628_s3 + $0x60] sm:$0xff] }
   0x5   :  { %386 = vmatpush3.msra.mxu1 %v193_v4 }
   0x6   :  { %387 = vmatprep.subr.mxu1 %v192_v5 }
   0x7   :  { %353 = vmatpush3.xpose.msk.msra.mxu0 %vm46_vm0, %v37_v1  ;;  %388 = vmatpush3.msra.mxu1 %v192_v5 }
   0x8   :  { %354 = vmatprep.subr.msk.mxu0 %vm46_vm0, %v36_v2 }
   0xb   :  { %355 = vmatpush3.xpose.msk.msra.mxu0 %vm46_vm0, %v36_v2 }
   0xc   :  { %10 = vsyncpa [#allocation3], 0  ;;  %356 = vmatprep.subr.msk.mxu0 %vm46_vm0, %v35_v6  ;;  %389 = vmatprep.subr.mxu1 %v191_v7  ;;  %v34_v9 = vld [vmem:[%s626_s1 + $0x58] sm:$0xff]  ;;  %v188_v11 = vld [vmem:[%s628_s3 + $0x50] sm:$0xff] }
   0xd   :  { %390 = vmatpush3.msra.mxu1 %v191_v7  ;;  %v189_v10 = vld [vmem:[%s628_s3 + $0x58] sm:$0xff]  ;;  %v33_v12 = vld [vmem:[%s626_s1 + $0x50] sm:$0xff]  ;;  %v187_v13 = vld [vmem:[%s628_s3 + $0x48] sm:$0xff] }
   0xe   :  { %391 = vmatprep.subr.mxu1 %v190_v8  ;;  %v186_v14 = vld [vmem:[%s628_s3 + $0x40] sm:$0xff]  ;;  %v32_v15 = vld [vmem:[%s626_s1 + $0x48] sm:$0xff]  ;;  %v185_v16 = vld [vmem:[%s628_s3 + $0x38] sm:$0xff] }
   0xf   :  { %357 = vmatpush3.xpose.msk.msra.mxu0 %vm46_vm0, %v35_v6  ;;  %392 = vmatpush3.msra.mxu1 %v190_v8  ;;  %v184_v17 = vld [vmem:[%s628_s3 + $0x30] sm:$0xff]  ;;  %v31_v18 = vld [vmem:[%s626_s1 + $0x40] sm:$0xff]  ;;  %v183_v19 = vld [vmem:[%s628_s3 + $0x28] sm:$0xff] }
  0x10   :  { %358 = vmatprep.subr.msk.mxu0 %vm46_vm0, %v34_v9  ;;  %393 = vmatprep.subr.mxu1 %v189_v10  ;;  %v182_v20 = vld [vmem:[%s628_s3 + $0x20] sm:$0xff]  ;;  %v30_v21 = vld [vmem:[%s626_s1 + $0x38] sm:$0xff]  ;;  %v29_v22 = vld [vmem:[%s626_s1 + $0x30] sm:$0xff] }
  0x11   :  { %394 = vmatpush3.msra.mxu1 %v189_v10  ;;  %v28_v23 = vld [vmem:[%s626_s1 + $0x28] sm:$0xff]  ;;  %v27_v24 = vld [vmem:[%s626_s1 + $0x20] sm:$0xff]  ;;  %v26_v25 = vld [vmem:[%s626_s1 + $0x18] sm:$0xff] }
  0x12   :  { %395 = vmatprep.subr.mxu1 %v188_v11  ;;  %v25_v26 = vld [vmem:[%s626_s1 + $0x10] sm:$0xff]  ;;  %v24_v27 = vld [vmem:[%s626_s1 + $0x8] sm:$0xff]  ;;  %v23_v28 = vld [vmem:[%s626_s1] sm:$0xff] }
  0x13   :  { %359 = vmatpush3.xpose.msk.msra.mxu0 %vm46_vm0, %v34_v9  ;;  %396 = vmatpush3.msra.mxu1 %v188_v11  ;;  %v22_v29 = vld [vmem:[%s625_s0 + $0x8] sm:$0xff]  ;;  %v181_v30 = vld [vmem:[%s628_s3 + $0x18] sm:$0xff]  ;;  %v180_v31 = vld [vmem:[%s628_s3 + $0x10] sm:$0xff] }
  0x14   :  { %360 = vmatprep.subr.msk.mxu0 %vm46_vm0, %v33_v12  ;;  %397 = vmatprep.subr.mxu1 %v187_v13  ;;  %v179_v32 = vld [vmem:[%s628_s3 + $0x8] sm:$0xff]  ;;  %v178_v33 = vld [vmem:[%s628_s3] sm:$0xff]  ;;  %s445_s3 = smov [#allocation2]  }
  0x15   :  { %398 = vmatpush3.msra.mxu1 %v187_v13  ;;  %v294_v34 = vld [vmem:[%s627_s2] ss:$0 sm:$0xff]  ;;  %s283_s13 = sshll.u32 %s445_s3, 4  ;;  %s284_s13 = int_to_ptr.vmem [resolvable:$true] %s283_s13 }
  0x16   :  { %399 = vmatprep.subr.mxu1 %v186_v14  ;;  %v313_v41 = vld [vmem:[%s629_s4] ss:$0 sm:$0xff]  ;;  %s423_s2 = scalar_lea.vmem %s284_s13, 256  ;;  %p428_p1 = scmp.lt.s32.totalorder %s284_s13, %s284_s13 }
  0x17   :  { %361 = vmatpush3.xpose.msk.msra.mxu0 %vm46_vm0, %v33_v12  ;;  %400 = vmatpush3.msra.mxu1 %v186_v14  ;;  %p424_p0 = scmp.ne.s32.totalorder %s284_s13, %s423_s2  ;;  %p429_p2 = scmp.lt.s32.totalorder %s423_s2, %s423_s2 }
  0x18   :  { %362 = vmatprep.subr.msk.mxu0 %vm46_vm0, %v32_v15  ;;  %401 = vmatprep.subr.mxu1 %v185_v16 }
  0x19   :  { %402 = vmatpush3.msra.mxu1 %v185_v16  ;;  %p430_p3 = por %p429_p2, %p428_p1 }
  0x1a   :  { %403 = vmatprep.subr.mxu1 %v184_v17 }
  0x1b   :  { %363 = vmatpush3.xpose.msk.msra.mxu0 %vm46_vm0, %v32_v15  ;;  %404 = vmatpush3.msra.mxu1 %v184_v17  ;;  %p431_p4 = pnand %p430_p3, %p424_p0 }
  0x1c   :  { %364 = vmatprep.subr.msk.mxu0 %vm46_vm0, %v31_v18  ;;  %405 = vmatprep.subr.mxu1 %v183_v19 }
  0x1d   :  { %406 = vmatpush3.msra.mxu1 %v183_v19 }
  0x1e   :  { %407 = vmatprep.subr.mxu1 %v182_v20 }
  0x1f   :  { %365 = vmatpush3.xpose.msk.msra.mxu0 %vm46_vm0, %v31_v18  ;;  %408 = vmatpush3.msra.mxu1 %v182_v20 }
  0x20   :  { %366 = vmatprep.subr.msk.mxu0 %vm46_vm0, %v30_v21  ;;  %409 = vmatprep.subr.mxu1 %v181_v30 }
  0x21   :  { %410 = vmatpush3.msra.mxu1 %v181_v30 }
  0x22   :  { %411 = vmatprep.subr.mxu1 %v180_v31 }
  0x23   :  { %367 = vmatpush3.xpose.msk.msra.mxu0 %vm46_vm0, %v30_v21  ;;  %412 = vmatpush3.msra.mxu1 %v180_v31 }
  0x24   :  { %368 = vmatprep.subr.msk.mxu0 %vm46_vm0, %v29_v22  ;;  %413 = vmatprep.subr.mxu1 %v179_v32 }
  0x25   :  { %414 = vmatpush3.msra.mxu1 %v179_v32 }
  0x26   :  { %415 = vmatprep.subr.mxu1 %v178_v33 }
  0x27   :  { %369 = vmatpush3.xpose.msk.msra.mxu0 %vm46_vm0, %v29_v22  ;;  %416 = vmatpush3.msra.mxu1 %v178_v33 }
  0x28   :  { %370 = vmatprep.subr.msk.mxu0 %vm46_vm0, %v28_v23 }
  0x2b   :  { %371 = vmatpush3.xpose.msk.msra.mxu0 %vm46_vm0, %v28_v23 }
  0x2c   :  { %372 = vmatprep.subr.msk.mxu0 %vm46_vm0, %v27_v24 }
  0x2f   :  { %373 = vmatpush3.xpose.msk.msra.mxu0 %vm46_vm0, %v27_v24 }
  0x30   :  { %374 = vmatprep.subr.msk.mxu0 %vm46_vm0, %v26_v25 }
  0x33   :  { %375 = vmatpush3.xpose.msk.msra.mxu0 %vm46_vm0, %v26_v25 }
  0x34   :  { %376 = vmatprep.subr.msk.mxu0 %vm46_vm0, %v25_v26 }
  0x37   :  { %377 = vmatpush3.xpose.msk.msra.mxu0 %vm46_vm0, %v25_v26 }
  0x38   :  { %378 = vmatprep.subr.msk.mxu0 %vm46_vm0, %v24_v27 }
  0x3b   :  { %379 = vmatpush3.xpose.msk.msra.mxu0 %vm46_vm0, %v24_v27 }
  0x3c   :  { %380 = vmatprep.subr.msk.mxu0 %vm46_vm0, %v23_v28 }
  0x3f   :  { %381 = vmatpush3.xpose.msk.msra.mxu0 %vm46_vm0, %v23_v28 }
  0x42   :  { %383 = vmatmul.mubr.msk.f32.vlgmr.msra.gmra.mxu0 %vm46_vm0, %v22_v29 }
 0x102   :  { %v384_v35 = vpop.f32.mrf.mxu0 }
 0x103   :  { %v173_v36 = vadd.f32 %v384_v35, %v294_v34 }
 0x104   :  { %v167_v37 = vpop.f32.mrf.mxu0 }
 0x105   :  { %v168_v38 = vadd.f32 %v294_v34, %v167_v37  ;;  %v177_v40 = vmax.f32 %v173_v36, 0.0 }
 0x107   :  { %v176_v39 = vmax.f32 %v168_v38, 0.0 }
 0x109   :  { %417 = vmatprep.mubr.f32.mxu1 %v176_v39 }
 0x10a   :  { %418 = vmatmul.mubr.f32.vlgmr.msra.gmra.mxu1 %v177_v40 }
 0x1ca   :  { %v419_v42 = vpop.f32.mrf.mxu1 }
 0x1cb   :  { %v273_v43 = vadd.f32 %v419_v42, %v313_v41 }
 0x1cc   :  { %v267_v44 = vpop.f32.mrf.mxu1 }
 0x1cd   :  { %277 = vst.msk [vmem:[#allocation2 + $0x8] sm:$0xff] %vm46_vm0, %v273_v43  ;;  %v268_v45 = vadd.f32 %v313_v41, %v267_v44 }
 0x1cf   :  { %276 = vst.msk [vmem:[#allocation2] sm:$0xff] %vm46_vm0, %v268_v45 }
 0x1d0   :  { %434 = shalt.err (!%p431_p4)
}
 0x1d1   :  { %s446_s14 = smov 128   ;;  %s447_s4 = smov 8  }
 0x1d2   :  { %289 = dma.vmem_to_hbm [thread:$0]  %s284_s13, 256, %s630_s5, [#allocation3], %s446_s14, %s446_s14, %s447_s4  }
 0x1d3   :  { %443 = dma.done.wait [#allocation3], 256  }
 0x1d4   :  { %444 = vsyncadd [#allocation3], 4294967040 }
 0x1d5   :  { %293 = vsyncpa [#allocation3], 1 }

</bundles_post_ra>
